<compile_context>
chip_gen: v6e
topology: v6e:2x2x1
jax: 0.10.0
libtpu: 0.0.40
codegen_flags: <defaults>
</compile_context>

<pallas_src>
import functools
import math

import jax
import jax.numpy as jnp
from jax.experimental import pallas as pl
from jax.experimental.pallas import tpu as pltpu


# ---------------------------------------------------------------------------
# Kernel: streaming masked row-sum of the log-prob matrix + final combine.
# ---------------------------------------------------------------------------
def _kl_ls_kernel(x_ref, valid_ref, xt_ref, out_ref, acc_ref, *,
                  confidence, smoothing, row_entropy):
    j = pl.program_id(1)                      # vocab-tile index (inner axis)
    tb, tv = x_ref.shape
    n_slabs = tv // 128
    CH = 8                                    # 8 slabs = 1024 lanes per vreg partial

    @pl.when(j == 0)
    def _():
        acc_ref[...] = jnp.zeros_like(acc_ref)

    # Lane-chunked streaming sum: each 1024-lane chunk is folded into a
    # vreg-resident (tb, 128) partial (no full-tile f32 materialization),
    # then added once into the VMEM accumulator.
    for c0 in range(0, n_slabs, CH):
        hi = min(c0 + CH, n_slabs)
        part = x_ref[:, c0 * 128:(c0 + 1) * 128].astype(jnp.float32)
        for s in range(c0 + 1, hi):
            part = part + x_ref[:, s * 128:(s + 1) * 128].astype(jnp.float32)
        acc_ref[...] += part

    @pl.when(j == pl.num_programs(1) - 1)
    def _():
        # Single cross-lane (XLU) reduce + mask + combine, once per batch tile.
        rowsum = jnp.sum(acc_ref[...], axis=1, keepdims=True)          # (tb, 1)
        row_loss = (jnp.float32(row_entropy)
                    - jnp.float32(smoothing) * rowsum
                    - jnp.float32(confidence - smoothing) * xt_ref[...])
        total = jnp.sum(valid_ref[...] * row_loss)
        # Lane-dense, unmasked store; wrapper reads [:, 0, 0].
        out_ref[...] = jnp.broadcast_to(total, out_ref.shape)


# ---------------------------------------------------------------------------
# Helpers
# ---------------------------------------------------------------------------
def _xlogx(p):
    return float(p) * math.log(p) if p > 0.0 else 0.0


def _round_up(x, m):
    return ((x + m - 1) // m) * m


def _tpu_vmem_bytes():
    try:
        return int(pltpu.get_tpu_info().vmem_capacity_bytes)
    except Exception:
        return 64 * 2**20        # conservative (v7x-sized) fallback


# ---------------------------------------------------------------------------
# Wrapper
# ---------------------------------------------------------------------------
def label_smoothing_kldiv_loss(output, target, mask=None, *, label_smoothing,
                               tgt_vocab_size, ignore_index=-100,
                               tile_b=None, tile_v=None):
    """output: (B, V) float log-probs (f32 or bf16); target: (B,) int.
    mask: optional (B,) int/bool; rows with mask == 0 are zeroed (as in the
    PyTorch forward). Returns the scalar KL-div 'sum' loss."""
    B, V = output.shape
    assert V == tgt_vocab_size
    smoothing_value = label_smoothing / (tgt_vocab_size - 2)
    confidence = 1.0 - label_smoothing
    # sum_c y*log(y) for a kept row: confidence at target, smoothing elsewhere
    # (this module does NOT zero the padding *column*, only whole rows).
    row_entropy = _xlogx(confidence) + (tgt_vocab_size - 1) * _xlogx(smoothing_value)

    # ---- O(B) side terms in the wrapper (keeps the O(B*V) stream lean) ----
    target = target.astype(jnp.int32)
    if mask is None:
        valid = target != ignore_index
    else:
        valid = mask != 0
    valid_f = valid.astype(jnp.float32).reshape(B, 1)
    tgt_clip = jnp.clip(target, 0, V - 1)
    x_tgt = jnp.take_along_axis(output, tgt_clip[:, None], axis=1).astype(jnp.float32)

    # ---- generation-aware tile selection ----
    itemsize = jnp.dtype(output.dtype).itemsize
    sub_unit = {4: 8, 2: 16, 1: 32}.get(itemsize, 8)
    vmem_cap = _tpu_vmem_bytes()
    big_vmem = vmem_cap >= 96 * 2**20
    buf_cap = (16 if big_vmem else 6) * 2**20       # per-input-buffer byte cap

    if tile_v is None:
        tile_v = min(_round_up(V, 128), 16384 if big_vmem else 8192)
    assert tile_v % 128 == 0, "tile_v must be a multiple of 128"
    if tile_b is None:
        by_bytes = max(sub_unit, (buf_cap // (tile_v * itemsize) // sub_unit) * sub_unit)
        tile_b = min(128, _round_up(B, sub_unit), by_bytes)
        # keep >= 2 batch tiles so the "parallel" axis can feed both v7x TCs
        if B >= 2 * sub_unit and pl.cdiv(B, tile_b) < 2:
            tile_b = max(sub_unit, ((B // 2) // sub_unit) * sub_unit)
    assert tile_b % 8 == 0, "tile_b must be a multiple of 8"

    # ---- pad to tile-aligned shapes (zero log-probs add 0 to the row-sum;
    #      padded rows have valid == 0, so they contribute nothing) ----
    Bp, Vp = _round_up(B, tile_b), _round_up(V, tile_v)
    if Bp != B or Vp != V:
        output = jnp.pad(output, ((0, Bp - B), (0, Vp - V)))
    if Bp != B:
        valid_f = jnp.pad(valid_f, ((0, Bp - B), (0, 0)))
        x_tgt = jnp.pad(x_tgt, ((0, Bp - B), (0, 0)))
    nb, nv = Bp // tile_b, Vp // tile_v

    # ---- VMEM budget from the actual footprint (not a blanket 48 MiB) ----
    footprint = (2 * tile_b * tile_v * itemsize      # x tile, double-buffered
                 + 2 * 2 * tile_b * 4                # valid + x_tgt blocks
                 + 2 * 8 * 128 * 4                   # output block
                 + tile_b * 128 * 4)                 # accumulator scratch
    vmem_limit = int(min(max(footprint + 8 * 2**20, 24 * 2**20),
                         vmem_cap - 8 * 2**20))

    kernel = functools.partial(_kl_ls_kernel,
                               confidence=confidence,
                               smoothing=smoothing_value,
                               row_entropy=row_entropy)

    partials = pl.pallas_call(
        kernel,
        out_shape=jax.ShapeDtypeStruct((nb, 8, 128), jnp.float32),
        grid_spec=pltpu.PrefetchScalarGridSpec(
            num_scalar_prefetch=0,
            grid=(nb, nv),
            in_specs=[
                # log-prob tile in its native dtype (f32 or bf16; upcast in-register)
                pl.BlockSpec((tile_b, tile_v), lambda i, j: (i, j)),
                # per-row validity mask / gathered target log-prob: constant
                # along the vocab axis -> fetched once per batch tile
                pl.BlockSpec((tile_b, 1), lambda i, j: (i, 0)),
                pl.BlockSpec((tile_b, 1), lambda i, j: (i, 0)),
            ],
            out_specs=pl.BlockSpec((1, 8, 128), lambda i, j: (i, 0, 0)),
            scratch_shapes=[pltpu.VMEM((tile_b, 128), jnp.float32)],
        ),
        compiler_params=pltpu.CompilerParams(
            dimension_semantics=("parallel", "arbitrary"),
            vmem_limit_bytes=vmem_limit),
    )(output, valid_f, x_tgt)

    # Per-batch-tile partials -> scalar (tiny XLA reduce).
    return jnp.sum(partials[:, 0, 0])


# ---------------------------------------------------------------------------
# Pure-JAX reference mirroring the PyTorch module
# ---------------------------------------------------------------------------
def _reference(output, target, mask=None, *, label_smoothing, tgt_vocab_size,
               ignore_index=-100):
    B, V = output.shape
    smoothing_value = label_smoothing / (tgt_vocab_size - 2)
    confidence = 1.0 - label_smoothing
    model_prob = jnp.full((B, V), smoothing_value, dtype=jnp.float32)
    model_prob = model_prob.at[jnp.arange(B), jnp.clip(target, 0, V - 1)].set(confidence)
    invalid = (target == ignore_index) if mask is None else (mask == 0)
    model_prob = jnp.where(invalid[:, None], 0.0, model_prob)
    term = (jnp.where(model_prob > 0.0, model_prob * jnp.log(model_prob), 0.0)
            - model_prob * output.astype(jnp.float32))
    return jnp.sum(term)


if __name__ == "__main__":
    label_smoothing = 0.1
    tgt_vocab_size = 512
    ignore_index = -100

    B, V = 128, tgt_vocab_size
    key = jax.random.PRNGKey(0)
    k1, k2, k3 = jax.random.split(key, 3)

    logits = jax.random.normal(k1, (B, V), dtype=jnp.float32)
    output = jax.nn.log_softmax(logits, axis=-1)          # model log-probs
    target = jax.random.randint(k2, (B,), 0, V, dtype=jnp.int32)
    target = target.at[jnp.array([3, 17, 64])].set(ignore_index)

    ref = _reference(output, target, label_smoothing=label_smoothing,
                     tgt_vocab_size=tgt_vocab_size, ignore_index=ignore_index)

    # 1) auto (generation-aware) tiling
    loss0 = jax.block_until_ready(label_smoothing_kldiv_loss(
        output, target, label_smoothing=label_smoothing,
        tgt_vocab_size=tgt_vocab_size, ignore_index=ignore_index))
    assert jnp.allclose(loss0, ref, rtol=1e-4, atol=1e-2), (loss0, ref)

    # 2) explicit (batch x vocab) tiling path, grid = (2, 2)
    loss1 = jax.block_until_ready(label_smoothing_kldiv_loss(
        output, target, label_smoothing=label_smoothing,
        tgt_vocab_size=tgt_vocab_size, ignore_index=ignore_index,
        tile_b=64, tile_v=256))
    assert jnp.allclose(loss1, ref, rtol=1e-4, atol=1e-2), (loss1, ref)

    # 3) bf16 log-probs (halves HBM bytes; kernel upcasts in-register)
    out_bf16 = output.astype(jnp.bfloat16)
    ref_bf16 = _reference(out_bf16, target, label_smoothing=label_smoothing,
                          tgt_vocab_size=tgt_vocab_size, ignore_index=ignore_index)
    loss2 = jax.block_until_ready(label_smoothing_kldiv_loss(
        out_bf16, target, label_smoothing=label_smoothing,
        tgt_vocab_size=tgt_vocab_size, ignore_index=ignore_index))
    assert jnp.allclose(loss2, ref_bf16, rtol=1e-3, atol=1e-1), (loss2, ref_bf16)

    # 4) explicit mask path (rows with mask == 0 are zeroed)
    mask = (jnp.arange(B) % 7 != 0).astype(jnp.int32)
    tgt_m = jnp.clip(target, 0, V - 1)       # in-vocab targets when a mask is used
    ref_m = _reference(output, tgt_m, mask, label_smoothing=label_smoothing,
                       tgt_vocab_size=tgt_vocab_size, ignore_index=ignore_index)
    loss3 = jax.block_until_ready(label_smoothing_kldiv_loss(
        output, tgt_m, mask, label_smoothing=label_smoothing,
        tgt_vocab_size=tgt_vocab_size, ignore_index=ignore_index))
    assert jnp.allclose(loss3, ref_m, rtol=1e-4, atol=1e-2), (loss3, ref_m)

    # 5) non-tile-aligned shapes exercise the internal zero-padding path
    B2, V2 = 100, 500
    k4, k5 = jax.random.split(k3)
    out2 = jax.nn.log_softmax(jax.random.normal(k4, (B2, V2), jnp.float32), axis=-1)
    tgt2 = jax.random.randint(k5, (B2,), 0, V2, dtype=jnp.int32)
    tgt2 = tgt2.at[0].set(ignore_index)
    ref2 = _reference(out2, tgt2, label_smoothing=label_smoothing,
                      tgt_vocab_size=V2, ignore_index=ignore_index)
    loss4 = jax.block_until_ready(label_smoothing_kldiv_loss(
        out2, tgt2, label_smoothing=label_smoothing,
        tgt_vocab_size=V2, ignore_index=ignore_index))
    assert jnp.allclose(loss4, ref2, rtol=1e-4, atol=1e-2), (loss4, ref2)

    print("KERNEL_OK")
</pallas_src>

<mosaic_0001>
module attributes {stable_mosaic.version = 11 : i64} {
  func.func @_kl_ls_kernel(%arg0: i32, %arg1: i32, %arg2: memref<64x512xf32, #tpu.memory_space<vmem>>, %arg3: memref<64x1xf32, #tpu.memory_space<vmem>>, %arg4: memref<64x1xf32, #tpu.memory_space<vmem>>, %arg5: memref<1x8x128xf32, #tpu.memory_space<vmem>>, %arg6: memref<64x128xf32, #tpu.memory_space<vmem>>) attributes {dimension_semantics = [#tpu.dimension_semantics<parallel>, #tpu.dimension_semantics<arbitrary>], iteration_bounds = array<i64: 2, 1>, scalar_prefetch = 0 : i64, scratch_operands = 1 : i64, tpu.core_type = #tpu.core_type<tc>, window_params = [{transform_indices = @transform_0, window_bounds = array<i64: 64, 512>}, {transform_indices = @transform_1, window_bounds = array<i64: 64, 1>}, {transform_indices = @transform_2, window_bounds = array<i64: 64, 1>}, {transform_indices = @transform_3, window_bounds = array<i64: 1, 8, 128>}]} {
    %c0_i32 = arith.constant 0 : i32
    %0 = arith.cmpi eq, %arg1, %c0_i32 : i32
    %1 = arith.extui %0 : i1 to i32
    %c0_i32_0 = arith.constant 0 : i32
    %2 = arith.cmpi ne, %1, %c0_i32_0 : i32
    scf.if %2 {
      %cst = arith.constant 0.000000e+00 : f32
      %16 = vector.broadcast %cst : f32 to vector<64x128xf32>
      %c0_11 = arith.constant 0 : index
      %c0_12 = arith.constant 0 : index
      %17 = vector.load %arg6[%c0_11, %c0_12] : memref<64x128xf32, #tpu.memory_space<vmem>>, vector<64x128xf32>
      tpu.vector_store %arg6[%c0_11, %c0_12], %16 {strides = array<i32>} : memref<64x128xf32, #tpu.memory_space<vmem>>, vector<64x128xf32>,
    } else {
    }
    %c0 = arith.constant 0 : index
    %c0_1 = arith.constant 0 : index
    %3 = vector.load %arg2[%c0, %c0_1] : memref<64x512xf32, #tpu.memory_space<vmem>>, vector<64x128xf32>
    %c0_2 = arith.constant 0 : index
    %c128 = arith.constant 128 : index
    %4 = vector.load %arg2[%c0_2, %c128] : memref<64x512xf32, #tpu.memory_space<vmem>>, vector<64x128xf32>
    %5 = arith.addf %3, %4 : vector<64x128xf32>
    %c0_3 = arith.constant 0 : index
    %c256 = arith.constant 256 : index
    %6 = vector.load %arg2[%c0_3, %c256] : memref<64x512xf32, #tpu.memory_space<vmem>>, vector<64x128xf32>
    %7 = arith.addf %5, %6 : vector<64x128xf32>
    %c0_4 = arith.constant 0 : index
    %c384 = arith.constant 384 : index
    %8 = vector.load %arg2[%c0_4, %c384] : memref<64x512xf32, #tpu.memory_space<vmem>>, vector<64x128xf32>
    %9 = arith.addf %7, %8 : vector<64x128xf32>
    %c0_5 = arith.constant 0 : index
    %c0_6 = arith.constant 0 : index
    %10 = vector.load %arg6[%c0_5, %c0_6] : memref<64x128xf32, #tpu.memory_space<vmem>>, vector<64x128xf32>
    %11 = arith.addf %10, %9 : vector<64x128xf32>
    %c0_7 = arith.constant 0 : index
    %c0_8 = arith.constant 0 : index
    %12 = vector.load %arg6[%c0_7, %c0_8] : memref<64x128xf32, #tpu.memory_space<vmem>>, vector<64x128xf32>
    tpu.vector_store %arg6[%c0_7, %c0_8], %11 {strides = array<i32>} : memref<64x128xf32, #tpu.memory_space<vmem>>, vector<64x128xf32>,
    %c0_i32_9 = arith.constant 0 : i32
    %13 = arith.cmpi eq, %arg1, %c0_i32_9 : i32
    %14 = arith.extui %13 : i1 to i32
    %c0_i32_10 = arith.constant 0 : i32
    %15 = arith.cmpi ne, %14, %c0_i32_10 : i32
    scf.if %15 {
      %c0_11 = arith.constant 0 : index
      %c0_12 = arith.constant 0 : index
      %16 = vector.load %arg6[%c0_11, %c0_12] : memref<64x128xf32, #tpu.memory_space<vmem>>, vector<64x128xf32>
      %cst = arith.constant dense<0.000000e+00> : vector<64xf32>
      %17 = vector.multi_reduction <add>, %16, %cst [1] : vector<64x128xf32> to vector<64xf32>
      %18 = vector.shape_cast %17 : vector<64xf32> to vector<64x1xf32>
      %cst_13 = arith.constant 1.96078428E-4 : f32
      %19 = vector.broadcast %cst_13 : f32 to vector<64x1xf32>
      %20 = arith.mulf %19, %18 : vector<64x1xf32>
      %cst_14 = arith.constant -0.950197994 : f32
      %21 = vector.broadcast %cst_14 : f32 to vector<64x1xf32>
      %22 = arith.subf %21, %20 : vector<64x1xf32>
      %c0_15 = arith.constant 0 : index
      %c0_16 = arith.constant 0 : index
      %23 = vector.load %arg4[%c0_15, %c0_16] : memref<64x1xf32, #tpu.memory_space<vmem>>, vector<64x1xf32>
      %cst_17 = arith.constant 0.899803936 : f32
      %24 = vector.broadcast %cst_17 : f32 to vector<64x1xf32>
      %25 = arith.mulf %24, %23 : vector<64x1xf32>
      %26 = arith.subf %22, %25 : vector<64x1xf32>
      %c0_18 = arith.constant 0 : index
      %c0_19 = arith.constant 0 : index
      %27 = vector.load %arg3[%c0_18, %c0_19] : memref<64x1xf32, #tpu.memory_space<vmem>>, vector<64x1xf32>
      %28 = arith.mulf %27, %26 : vector<64x1xf32>
      %29 = vector.shape_cast %28 : vector<64x1xf32> to vector<1x64x1xf32>
      %cst_20 = arith.constant dense<0.000000e+00> : vector<1xf32>
      %30 = vector.multi_reduction <add>, %29, %cst_20 [1, 2] : vector<1x64x1xf32> to vector<1xf32>
      %31 = vector.shape_cast %30 : vector<1xf32> to vector<1x1x1xf32>
      %32 = vector.extract %31[0, 0, 0] : f32 from vector<1x1x1xf32>
      %33 = vector.broadcast %32 : f32 to vector<1x8x128xf32>
      %c0_21 = arith.constant 0 : index
      %c0_22 = arith.constant 0 : index
      %c0_23 = arith.constant 0 : index
      %34 = vector.load %arg5[%c0_21, %c0_22, %c0_23] : memref<1x8x128xf32, #tpu.memory_space<vmem>>, vector<1x8x128xf32>
      tpu.vector_store %arg5[%c0_21, %c0_22, %c0_23], %33 {strides = array<i32>} : memref<1x8x128xf32, #tpu.memory_space<vmem>>, vector<1x8x128xf32>,
    } else {
    }
    return
  }
  func.func @transform_0(%arg0: i32, %arg1: i32) -> (i32, i32) {
    %c0_i32 = arith.constant 0 : i32
    return %arg0, %arg1 : i32, i32
  }
  func.func @transform_1(%arg0: i32, %arg1: i32) -> (i32, i32) {
    %c0_i32 = arith.constant 0 : i32
    %c0_i32_0 = arith.constant 0 : i32
    return %arg0, %c0_i32 : i32, i32
  }
  func.func @transform_2(%arg0: i32, %arg1: i32) -> (i32, i32) {
    %c0_i32 = arith.constant 0 : i32
    %c0_i32_0 = arith.constant 0 : i32
    return %arg0, %c0_i32 : i32, i32
  }
  func.func @transform_3(%arg0: i32, %arg1: i32) -> (i32, i32, i32) {
    %c0_i32 = arith.constant 0 : i32
    %c0_i32_0 = arith.constant 0 : i32
    %c0_i32_1 = arith.constant 0 : i32
    return %arg0, %c0_i32, %c0_i32_0 : i32, i32, i32
  }
}

</mosaic_0001>

<bundles_post_ra>
// kernel: tpu_custom_call.1
= control target key start
LH: loop header
LB: loop body
LE: loop exit
PB: predicated region body
PF: predicated region fallthrough
CT: control target
= control target key end

     0   :  { %8 = vsyncpa [#allocation4], 0  ;;  %s1002_s0 = inlined_call_operand.hbm [shape: f32[128,512], index: 0, kind: input, shape index: {}]   ;;  %s1003_s1 = inlined_call_operand.vmem [shape: f32[128,1], index: 1, kind: input, shape index: {}]   ;;  %s1004_s2 = inlined_call_operand.vmem [shape: f32[128,1], index: 2, kind: input, shape index: {}]   ;;  %s1005_s3 = inlined_call_operand.hbm [shape: f32[2,8,128], index: 3, kind: output, shape index: {}]  }
   0x1   :  { %10 = vsyncpa [#allocation4 + $0x1], 0 }
   0x2   :  { %11 = vsyncpa [#allocation5], 0 }
   0x3   :  { %13 = vsyncpa [#allocation5 + $0x1], 0  ;;  %s794_s12 = smov 0   ;;  %s796_s13 = smov 0  }
   0x4   :  { %s798_s14 = smov 0   ;;  %s800_s15 = smov 0  }
   0x5   :  { %s802_s16 = smov 0   ;;  %s804_s17 = smov 0  }
   0x6 LB: > { %s573_s18 = sadd.s32 4294967295, %s768_s17   ;;  %s574_s19 = sadd.s32 4294967294, %s768_s17   ;;  %s768_s17 = sphi %s804_s17, %s19_s17   ;;  %s764_s16 = sphi %s802_s16, %s1016_s16   ;;  %s760_s15 = sphi %s800_s15, %s1015_s15   ;;  %s756_s14 = sphi %s798_s14, %s1014_s14   ;;  %s752_s13 = sphi %s796_s13, %s1013_s13   ;;  %s748_s12 = sphi %s794_s12, %s1012_s12  }
   0x7   : > { %s31_s20 = sadd.s32 1, %s764_s16  ;;  %s40_s21 = sadd.s32 1, %s756_s14 }
   0x8   : > { %p33_p0 = scmp.ge.s32.totalorder %s31_s20, 2  ;;  %p47_p1 = scmp.ne.s32.totalorder %s756_s14, %s752_s13 }
   0x9   : > { %p48_p2 = scmp.eq.s32.totalorder %s768_s17, 0  ;;  %p53_p3 = scmp.ne.s32.totalorder %s752_s13, %s748_s12 }
   0xa   : > { %s1018_s20 = smov (%p33_p0, %s31_s20), 0  ;;  %p54_p5 = scmp.eq.s32.totalorder %s573_s18, 0 }
   0xb   : > { %p835_p4 = por %p48_p2, %p47_p1  ;;  %s35_s23 = ssub.s32 %s764_s16, %s1018_s20 }
   0xc   : > { %p129_p6 = scmp.eq.s32.totalorder %s573_s18, 1  ;;  %p38_p7 = scmp.eq.s32.totalorder %s35_s23, 0 }
   0xd   : > { %p841_p8 = por %p54_p5, %p53_p3  ;;  %p135_p10 = scmp.eq.s32.totalorder %s574_s19, 1 }
   0xe   : > { %p845_p9 = por %p129_p6, %p47_p1  ;;  %p608_p13 = scmp.lt.s32.totalorder %s768_s17, 2 }
   0xf   : > { %s850_s26 = scalar_select %p38_p7, %s756_s14, %s40_s21  }
  0x10   : > { %p852_p11 = por %p135_p10, %p53_p3  ;;  %s155_s28 = sand.u32 1, %s756_s14  }
  0x11   : > { %s577_s29 = sshll.u32 %s155_s28, 8  ;;  %s593_s30 = sshll.u32 %s764_s16, 12 }
  0x12   : > { %s168_s6 = scalar_lea.hbm %s1002_s0, %s593_s30  ;;  %s159_s7 = scalar_lea.vmem [#allocation3], %s577_s29 }
  0x13   : > { %s169_s8 = sshll.u32 %s159_s7, 4  ;;  %p865_p0 = pnand %p608_p13, %p835_p4  ;;  %s170_s8 = int_to_ptr.vmem [resolvable:$true] %s169_s8 }
  0x14   : > { %p581_p1 = scmp.ge.s32.totalorder %s768_s17, 1  ;;  %s156_s10 = scalar_lea.sflag [#allocation4], %s155_s28 }
  0x15   : > { %p662_p2 = pneg %p865_p0  ;;  %s673_s11 = scalar_lea.vmem %s170_s8, 4096 }
  0x16   : > { %p674_p3 = scmp.ne.s32.totalorder %s170_s8, %s673_s11  ;;  %s770_s18 = smov [#allocation3]  }
  0x17   : > { %s678_s19 = sshll.u32 %s770_s18, 4  ;;  %s679_s19 = int_to_ptr.vmem [resolvable:$false] %s678_s19 }
  0x18   : > { %p676_p5 = pnand %p674_p3, %p662_p2  ;;  %s680_s21 = scalar_lea.vmem %s679_s19, 8192 }
  0x19   : > { %p681_p7 = scmp.lt.s32.totalorder %s170_s8, %s679_s19  ;;  %p682_p10 = scmp.lt.s32.totalorder %s680_s21, %s673_s11 }
  0x1a   : > { %p677_p6 = pneg %p676_p5 }
  0x1b   : > { %p683_p12 = por %p682_p10, %p681_p7 }
  0x1d   : > { %p684_p4 = pnand %p683_p12, %p677_p6 }
  0x1f   : > { %687 = shalt.err (!%p684_p4)
}
  0x20   : > { %s771_s22 = smov 512   ;;  %s772_s23 = smov 32  }
  0x21   : > { %603 = dma.hbm_to_vmem [thread:$0]  (!%p865_p0), %s168_s6, 4096, %s170_s8, %s156_s10, %s771_s22, %s771_s22, %s772_s23  }
  0x22   : > { %p195_p13 = scmp.lt.s32.totalorder %s768_s17, 3 }
  0x24   : > { %p196_p2 = pnand %p581_p1, %p195_p13 }
  0x25   : > { %s878_s28 = sand.u32 (!%p196_p2), 1, %s752_s13  }
  0x26   : > { %199 = sbr.rel (%p196_p2) target bundleno = 430 (0x1ae), region = 32  ;;  %s582_s29 = sshll.u32 (!%p196_p2), %s878_s28, 8 }
  0x27   : > { %s202_s30 = scalar_lea.sflag (!%p196_p2), [#allocation4], %s878_s28  ;;  %s882_s4 = scalar_lea.vmem (!%p196_p2), [#allocation3], %s582_s29 }
  0x2b   : > { %739 = dma.done.wait (%p841_p8), %s202_s30, 4096  }
  0x2c   : > { %741 = vsyncadd (%p841_p8), %s202_s30, 4294963200  ;;  %v264_v0 = vld [vmem:[%s882_s4] sm:$0xff]  ;;  %v272_v1 = vld [vmem:[%s882_s4 + $0x8] sm:$0xff]  ;;  %s584_s24 = sshll.u32 %s760_s15, 3  ;;  %vm427_vm0 = vcmask 7168   ;;  %s583_s18 = sshll.u32 %s878_s28, 3 }
  0x2d   : > { %v288_v2 = vld [vmem:[%s882_s4 + $0x10] sm:$0xff]  ;;  %v280_v3 = vadd.f32 %v272_v1, %v264_v0  ;;  %v266_v4 = vld [vmem:[%s882_s4 + $0x40] sm:$0xff]  ;;  %v274_v5 = vld [vmem:[%s882_s4 + $0x48] sm:$0xff]  ;;  %p241_p8 = scmp.lt.s32.totalorder %s584_s24, 15  ;;  %s237_s19 = scalar_lea.vmem [#allocation6], %s583_s18 }
  0x2e   : > { %v304_v6 = vld [vmem:[%s882_s4 + $0x18] sm:$0xff]  ;;  %v282_v7 = vadd.f32 %v274_v5, %v266_v4  ;;  %v290_v8 = vld [vmem:[%s882_s4 + $0x50] sm:$0xff]  ;;  %v265_v9 = vld [vmem:[%s882_s4 + $0x20] sm:$0xff]  ;;  %s468_s21 = sshll.u32 %s237_s19, 4  ;;  %s589_s22 = sshll.u32 %s760_s15, 7  ;;  %s957_s21 = int_to_ptr.vmem [resolvable:$true] %s468_s21 }
  0x2f   : > { %v296_v10 = vadd.f32 %v288_v2, %v280_v3  ;;  %v306_v11 = vld [vmem:[%s882_s4 + $0x58] sm:$0xff]  ;;  %v273_v12 = vld [vmem:[%s882_s4 + $0x28] sm:$0xff]  ;;  %v289_v13 = vld [vmem:[%s882_s4 + $0x30] sm:$0xff]  ;;  %s1020_s24 = smov (!%p241_p8, %s584_s24), 15  ;;  %s773_s6 = smov [#allocation6]  }
  0x30   : > { %v298_v14 = vadd.f32 %v290_v8, %v282_v7  ;;  %v281_v15 = vadd.f32 %v273_v12, %v265_v9  ;;  %v267_v16 = vld [vmem:[%s882_s4 + $0x60] sm:$0xff]  ;;  %v275_v17 = vld [vmem:[%s882_s4 + $0x68] sm:$0xff]  ;;  %v291_v18 = vld [vmem:[%s882_s4 + $0x70] sm:$0xff]  ;;  %s585_s5 = sshll.u32 %s1020_s24, 3  ;;  %s455_s24 = scalar_lea.sflag [#allocation5], %s878_s28 }
  0x31   : > { %v312_v19 = vadd.f32 %v304_v6, %v296_v10  ;;  %v305_v20 = vld [vmem:[%s882_s4 + $0x38] sm:$0xff]  ;;  %v283_v21 = vadd.f32 %v275_v17, %v267_v16  ;;  %v268_v22 = vld [vmem:[%s882_s4 + $0x80] sm:$0xff]  ;;  %v276_v23 = vld [vmem:[%s882_s4 + $0x88] sm:$0xff]  ;;  %s924_s8 = scalar_lea.vmem %s1004_s2, %s585_s5  ;;  %s932_s11 = scalar_lea.vmem %s1003_s1, %s585_s5 }
  0x32   : > { %v314_v24 = vadd.f32 %v306_v11, %v298_v14  ;;  %v297_v25 = vadd.f32 %v289_v13, %v281_v15  ;;  %v307_v26 = vld [vmem:[%s882_s4 + $0x78] sm:$0xff]  ;;  %v284_v27 = vadd.f32 %v276_v23, %v268_v22  ;;  %v292_v28 = vld [vmem:[%s882_s4 + $0x90] sm:$0xff]  ;;  %v269_v29 = vld [vmem:[%s882_s4 + $0xa0] sm:$0xff]  ;;  %s688_s5 = scalar_lea.vmem %s957_s21, 128  ;;  %s692_s15 = sshll.u32 %s773_s6, 4  ;;  %s693_s15 = int_to_ptr.vmem [resolvable:$false] %s692_s15 }
  0x33   : > { %355 = vadd.xlane.f32.xlu0 %v312_v19  ;;  %v299_v30 = vadd.f32 %v291_v18, %v283_v21  ;;  %v308_v31 = vld [vmem:[%s882_s4 + $0x98] sm:$0xff]  ;;  %v277_v32 = vld [vmem:[%s882_s4 + $0xa8] sm:$0xff]  ;;  %v293_v33 = vld [vmem:[%s882_s4 + $0xb0] sm:$0xff]  ;;  %p689_p12 = scmp.ne.s32.totalorder %s957_s21, %s688_s5  ;;  %s694_s7 = scalar_lea.vmem %s693_s15, 256 }
  0x34   : > { %359 = vadd.xlane.f32.xlu1 %v314_v24  ;;  %v313_v34 = vadd.f32 %v305_v20, %v297_v25  ;;  %v300_v35 = vadd.f32 %v292_v28, %v284_v27  ;;  %v285_v36 = vadd.f32 %v277_v32, %v269_v29  ;;  %v270_v37 = vld [vmem:[%s882_s4 + $0xc0] sm:$0xff]  ;;  %v278_v38 = vld [vmem:[%s882_s4 + $0xc8] sm:$0xff]  ;;  %v294_v39 = vld [vmem:[%s882_s4 + $0xd0] sm:$0xff]  ;;  %p695_p3 = scmp.lt.s32.totalorder %s957_s21, %s693_s15  ;;  %p696_p5 = scmp.lt.s32.totalorder %s694_s7, %s688_s5 }
  0x35   : > { %v315_v40 = vadd.f32 %v307_v26, %v299_v30  ;;  %v309_v41 = vld [vmem:[%s882_s4 + $0xb8] sm:$0xff]  ;;  %v286_v42 = vadd.f32 %v278_v38, %v270_v37  ;;  %v271_v43 = vld [vmem:[%s882_s4 + $0xe0] sm:$0xff]  ;;  %v279_v44 = vld [vmem:[%s882_s4 + $0xe8] sm:$0xff]  ;;  %p690_p0 = pnand %p689_p12, %p845_p9 }
  0x36   : > { %v301_v45 = vadd.f32 %v293_v33, %v285_v36  ;;  %v287_v46 = vadd.f32 %v279_v44, %v271_v43  ;;  %v295_v47 = vld [vmem:[%s882_s4 + $0xf0] sm:$0xff]  ;;  %v316_v48 = vadd.f32 %v308_v31, %v300_v35  ;;  %v310_v51 = vld [vmem:[%s882_s4 + $0xd8] sm:$0xff]  ;;  %v387_v56 = vld [vmem:[%s924_s8] sm:$0xff]  ;;  %p697_p6 = por %p696_p5, %p695_p3 }
  0x37   : > { %357 = vadd.xlane.f32.xlu0 %v313_v34  ;;  %v302_v49 = vadd.f32 %v294_v39, %v286_v42  ;;  %v311_v53 = vld [vmem:[%s882_s4 + $0xf8] sm:$0xff]  ;;  %v389_v58 = vld [vmem:[%s924_s8 + $0x10] sm:$0xff]  ;;  %v395_v59 = vmul.f32 0.89980394, %v387_v56  ;;  %v388_v63 = vld [vmem:[%s924_s8 + $0x8] sm:$0xff]  ;;  %s466_s4 = scalar_lea.hbm %s1005_s3, %s589_s22  ;;  %p691_p1 = pneg %p690_p0 }
  0x38   : > { %361 = vadd.xlane.f32.xlu1 %v315_v40  ;;  %v317_v50 = vadd.f32 %v309_v41, %v301_v45  ;;  %v303_v52 = vadd.f32 %v295_v47, %v287_v46  ;;  %v397_v1 = vmul.f32 0.89980394, %v389_v58  ;;  %v390_v2 = vld [vmem:[%s924_s8 + $0x18] sm:$0xff]  ;;  %v396_v6 = vmul.f32 0.89980394, %v388_v63  ;;  %v411_v9 = vld [vmem:[%s932_s11] sm:$0xff] }
  0x39   : > { %v318_v54 = vadd.f32 %v310_v51, %v302_v49  ;;  %v398_v10 = vmul.f32 0.89980394, %v390_v2  ;;  %v391_v12 = vld [vmem:[%s924_s8 + $0x20] sm:$0xff]  ;;  %v392_v15 = vld [vmem:[%s924_s8 + $0x28] sm:$0xff]  ;;  %v413_v16 = vld [vmem:[%s932_s11 + $0x10] sm:$0xff]  ;;  %p698_p7 = pnand %p697_p6, %p691_p1 }
  0x3a   : > { %v319_v55 = vadd.f32 %v311_v53, %v303_v52  ;;  %v412_v17 = vld [vmem:[%s932_s11 + $0x8] sm:$0xff]  ;;  %v414_v22 = vld [vmem:[%s932_s11 + $0x18] sm:$0xff]  ;;  %v399_v23 = vmul.f32 0.89980394, %v391_v12  ;;  %v393_v26 = vld [vmem:[%s924_s8 + $0x30] sm:$0xff] }
  0x3b   : > { %363 = vadd.xlane.f32.xlu0 %v316_v48  ;;  %v400_v28 = vmul.f32 0.89980394, %v392_v15  ;;  %v394_v33 = vld [vmem:[%s924_s8 + $0x38] sm:$0xff]  ;;  %v415_v35 = vld [vmem:[%s932_s11 + $0x20] sm:$0xff]  ;;  %v401_v37 = vmul.f32 0.89980394, %v393_v26 }
  0x3c   : > { %365 = vadd.xlane.f32.xlu1 %v317_v50  ;;  %v416_v42 = vld [vmem:[%s932_s11 + $0x28] sm:$0xff]  ;;  %v402_v47 = vmul.f32 0.89980394, %v394_v33 }
  0x3f   : > { %367 = vadd.xlane.f32.xlu0 %v318_v54 }
  0x40   : > { %369 = vadd.xlane.f32.xlu1 %v319_v55  ;;  %v417_v55 = vld [vmem:[%s932_s11 + $0x30] sm:$0xff] }
  0xbc   : > { %v356_v57 = vpop.xlane.xlu0 %355 }
  0xbd   : > { %v371_v60 = vmul.f32 0.00019607843, %v356_v57  ;;  %v360_v61 = vpop.xlane.xlu1 %359 }
  0xbe   : > { %v373_v62 = vmul.f32 0.00019607843, %v360_v61 }
  0xbf   : > { %v379_v0 = vsub.f32 -0.950198, %v371_v60 }
  0xc0   : > { %v381_v3 = vsub.f32 -0.950198, %v373_v62  ;;  %v358_v4 = vpop.xlane.xlu0 %357 }
  0xc1   : > { %v403_v5 = vsub.f32 %v379_v0, %v395_v59  ;;  %v372_v7 = vmul.f32 0.00019607843, %v358_v4  ;;  %v362_v8 = vpop.xlane.xlu1 %361  ;;  %v418_v59 = vld [vmem:[%s932_s11 + $0x38] sm:$0xff] }
  0xc2   : > { %v374_v11 = vmul.f32 0.00019607843, %v362_v8  ;;  %v405_v13 = vsub.f32 %v381_v3, %v397_v1 }
  0xc3   : > { %v380_v14 = vsub.f32 -0.950198, %v372_v7  ;;  %v419_v20 = vmul.f32 %v411_v9, %v403_v5 }
  0xc4   : > { %v382_v18 = vsub.f32 -0.950198, %v374_v11  ;;  %v364_v19 = vpop.xlane.xlu0 %363  ;;  %v421_v30 = vmul.f32 %v413_v16, %v405_v13 }
  0xc5   : > { %v404_v21 = vsub.f32 %v380_v14, %v396_v6  ;;  %v375_v24 = vmul.f32 0.00019607843, %v364_v19  ;;  %v366_v25 = vpop.xlane.xlu1 %365  ;;  %v428_v39 = vsel %vm427_vm0, %v419_v20, 0.0 }
  0xc6   : > { %v406_v27 = vsub.f32 %v382_v18, %v398_v10  ;;  %v376_v29 = vmul.f32 0.00019607843, %v366_v25  ;;  %v431_v49 = vsel %vm427_vm0, %v421_v30, 0.0 }
  0xc7   : > { %v420_v31 = vmul.f32 %v412_v17, %v404_v21  ;;  %v383_v32 = vsub.f32 -0.950198, %v375_v24 }
  0xc8   : > { %v422_v34 = vmul.f32 %v414_v22, %v406_v27  ;;  %v384_v36 = vsub.f32 -0.950198, %v376_v29  ;;  %v368_v38 = vpop.xlane.xlu0 %367 }
  0xc9   : > { %v429_v40 = vsel %vm427_vm0, %v420_v31, 0.0  ;;  %v407_v41 = vsub.f32 %v383_v32, %v399_v23  ;;  %v377_v43 = vmul.f32 0.00019607843, %v368_v38  ;;  %v370_v44 = vpop.xlane.xlu1 %369 }
  0xca   : > { %v430_v45 = vadd.f32 %v429_v40, %v428_v39  ;;  %v408_v46 = vsub.f32 %v384_v36, %v400_v28  ;;  %v378_v48 = vmul.f32 0.00019607843, %v370_v44  ;;  %v433_v50 = vsel %vm427_vm0, %v422_v34, 0.0 }
  0xcb   : > { %v423_v51 = vmul.f32 %v415_v35, %v407_v41  ;;  %v385_v52 = vsub.f32 -0.950198, %v377_v43 }
  0xcc   : > { %v432_v53 = vadd.f32 %v431_v49, %v430_v45  ;;  %v424_v54 = vmul.f32 %v416_v42, %v408_v46  ;;  %v386_v56 = vsub.f32 -0.950198, %v378_v48 }
  0xcd   : > { %v435_v57 = vsel %vm427_vm0, %v423_v51, 0.0  ;;  %v409_v58 = vsub.f32 %v385_v52, %v401_v37 }
  0xce   : > { %v434_v60 = vadd.f32 %v433_v50, %v432_v53  ;;  %v410_v61 = vsub.f32 %v386_v56, %v402_v47  ;;  %v437_v63 = vsel %vm427_vm0, %v424_v54, 0.0 }
  0xcf   : > { %v425_v62 = vmul.f32 %v417_v55, %v409_v58 }
  0xd0   : > { %v426_v0 = vmul.f32 %v418_v59, %v410_v61  ;;  %v436_v1 = vadd.f32 %v435_v57, %v434_v60 }
  0xd1   : > { %v439_v2 = vsel %vm427_vm0, %v425_v62, 0.0 }
  0xd2   : > { %v438_v3 = vadd.f32 %v437_v63, %v436_v1  ;;  %v441_v4 = vsel %vm427_vm0, %v426_v0, 0.0 }
  0xd4   : > { %v440_v5 = vadd.f32 %v439_v2, %v438_v3 }
  0xd6   : > { %v442_v6 = vadd.f32 %v441_v4, %v440_v5 }
  0xd8   : > { %443 = vadd.xlane.f32.xlu0 %v442_v6 }
 0x161   : > { %v444_v7 = vpop.xlane.xlu0 %443 }
 0x162   : > { %v445_v8 = vrot.slane %v444_v7, 4 }
 0x164   : > { %v446_v9 = vadd.f32 %v445_v8, %v444_v7 }
 0x166   : > { %v447_v10 = vrot.slane %v446_v9, 2 }
 0x168   : > { %v448_v11 = vadd.f32 %v447_v10, %v446_v9 }
 0x16a   : > { %v449_v12 = vrot.slane %v448_v11, 1 }
 0x16c   : > { %v450_v13 = vadd.f32 %v449_v12, %v448_v11 }
 0x16e   : > { %594 = vpush %v450_v13 }
 0x19f   : > { %s595_s23 = spop %594 }
 0x1a0   : > { %v452_v14 = vstv %s595_s23 }
 0x1a1   : > { %453 = vst [vmem:[%s237_s19] sm:$0xff] %v452_v14 }
 0x1a2   : > { %701 = shalt.err (!%p698_p7)
}
 0x1a3   : > { %s702_s8 = scalar_lea.hbm %s466_s4, 128  ;;  %s706_s10 = scalar_lea.hbm %s1005_s3, 256 }
 0x1a4   : > { %p703_p10 = scmp.ne.s32.totalorder %s466_s4, %s702_s8  ;;  %p707_p2 = scmp.lt.s32.totalorder %s466_s4, %s1005_s3 }
 0x1a5   : > { %p708_p8 = scmp.lt.s32.totalorder %s706_s10, %s702_s8 }
 0x1a6   : > { %p704_p4 = pnand %p703_p10, %p845_p9 }
 0x1a7   : > { %p709_p12 = por %p708_p8, %p707_p2 }
 0x1a8   : > { %p705_p13 = pneg %p704_p4 }
 0x1aa   : > { %p710_p0 = pnand %p709_p12, %p705_p13 }
 0x1ac   : > { %713 = shalt.err (!%p710_p0)
}
 0x1ad   : > { %598 = dma.vmem_to_hbm [thread:$0]  (%p845_p9), %s957_s21, 128, %s466_s4, %s455_s24  }
 0x1ae PF: > { %s480_s19 = sand.u32 1, %s748_s12   ;;  %p1011_p1 = scmp.ge.s32.totalorder %s768_s17, 2 }
 0x1af   : > { %s481_s22 = scalar_lea.sflag [#allocation5], %s480_s19 }
 0x1b0   : > { %p605_p3 = pnand %p1011_p1, %p852_p11 }
 0x1b2   : > { %p606_p5 = pneg %p605_p3 }
 0x1b4   : > { %743 = dma.done.wait (%p606_p5), %s481_s22, 128  }
 0x1b5   : > { %745 = vsyncadd (%p606_p5), %s481_s22, 4294967168  ;;  %s19_s17 = sadd.s32 1, %s768_s17   ;;  %s1012_s12 = smov %s752_s13 }
 0x1b6   : > { %p16_p6 = scmp.ge.s32.totalorder %s19_s17, 4   ;;  %s1013_s13 = smov %s756_s14 }
 0x1b7   : > { %s1014_s14 = smov %s850_s26  ;;  %s1015_s15 = smov %s764_s16 }
 0x1b8   : > { %s1016_s16 = smov %s1018_s20  ;;  %18 = sbr.rel (!%p16_p6) target bundleno = 6 (0x6), region = 91 }
 0x1bd   :  { %486 = vsyncpa [#allocation4], 1 }
 0x1be   :  { %488 = vsyncpa [#allocation4 + $0x1], 1 }
 0x1bf   :  { %489 = vsyncpa [#allocation5], 1 }
 0x1c0   :  { %491 = vsyncpa [#allocation5 + $0x1], 1 }

</bundles_post_ra>
